<compile_context>
chip_gen: v7x
topology: tpu7x:2x2x1
jax: 0.10.0
libtpu: 0.0.40
codegen_flags: <defaults>
</compile_context>

<pallas_src>
import functools

import jax
import jax.numpy as jnp
from jax import lax
from jax.experimental import pallas as pl
from jax.experimental.pallas import tpu as pltpu

_EPS = 1e-6  # matches torch.nn.functional.pairwise_distance default eps


def _round_down(x, m):
    return (x // m) * m


def _vmem_limit_bytes():
    """Generation-aware scoped-VMEM limit: v7x -> 48 MiB, v5e/v6e -> 64 MiB."""
    try:
        cap = int(pltpu.get_tpu_info().vmem_capacity_bytes)
    except Exception:
        cap = 64 * 1024 * 1024  # conservative fallback (v7x physical VMEM)
    return min((cap * 3) // 4, 64 * 1024 * 1024)


def _contrastive_loss_kernel(margin_ref, a_ref, b_ref, labels_ref, out_ref, *,
                             n_total, needs_mask):
    """One grid step: partial (unnormalized) contrastive-loss sum for this tile."""
    pid = pl.program_id(0)
    tile_n, _ = a_ref.shape

    # Cast on the VMEM tile (VPU work, hidden under the HBM stream).
    a = a_ref[...].astype(jnp.float32)
    b = b_ref[...].astype(jnp.float32)
    labels = labels_ref[...].astype(jnp.float32)          # (tile_n, 1)
    margin = margin_ref[0, 0]

    diff = a - b + _EPS                                    # eps matches torch
    dist_sq = jnp.sum(diff * diff, axis=-1, keepdims=True)  # (tile_n, 1)
    dist = jnp.sqrt(dist_sq)                               # only feeds the hinge
    hinge = jnp.maximum(margin - dist, 0.0)
    per_row = labels * dist_sq + (1.0 - labels) * hinge * hinge

    if needs_mask:
        # Ragged trailing tile: rows >= n_total hold undefined data; zero them.
        row = pid * tile_n + lax.broadcasted_iota(jnp.int32, (tile_n, 1), 0)
        per_row = jnp.where(row < n_total, per_row, 0.0)

    out_ref[...] = jnp.sum(per_row, axis=(0, 1), keepdims=True)   # (1, 1)


def contrastive_loss(embedding_a, embedding_b, labels, margin=1.0, *,
                     max_tile_rows=None):
    """Pallas TPU implementation of ContrastiveLoss.forward."""
    n, d = embedding_a.shape
    itemsize = max(embedding_a.dtype.itemsize, embedding_b.dtype.itemsize)

    vmem_limit = _vmem_limit_bytes()
    budget = (vmem_limit * 4) // 5        # headroom for compiler-internal scratch

    # Per-row live bytes:
    #   2 inputs x 2 pipeline buffers (native dtype)      : 4 * d * itemsize
    #   f32 intermediates (a, b/diff, sq, ...)             : ~4 * d * 4
    #   lane-padded (tile_n, 1) label buffers + f32 columns: ~3 KiB
    per_row_bytes = 4 * d * itemsize + 16 * d + 3 * 1024
    tile_budget = max(8, _round_down(budget // per_row_bytes, 8))
    if max_tile_rows is not None:
        tile_budget = max(8, _round_down(min(tile_budget, max_tile_rows), 8))

    # Single full block (legal for any n) when it fits; otherwise multiple-of-8
    # tiles with a masked ragged trailing block -- no wrapper-side padding.
    tile_n = n if n <= tile_budget else tile_budget
    num_tiles = pl.cdiv(n, tile_n)
    needs_mask = (n % tile_n) != 0

    labels_col = labels.reshape(n, 1)
    margin_arr = jnp.full((1, 1), margin, dtype=jnp.float32)

    kernel = functools.partial(_contrastive_loss_kernel,
                               n_total=n, needs_mask=needs_mask)
    partials = pl.pallas_call(
        kernel,
        out_shape=jax.ShapeDtypeStruct((num_tiles, 1), jnp.float32),
        grid=(num_tiles,),
        in_specs=[
            pl.BlockSpec(memory_space=pltpu.SMEM),          # margin scalar
            pl.BlockSpec((tile_n, d), lambda i: (i, 0)),    # embedding_a tile
            pl.BlockSpec((tile_n, d), lambda i: (i, 0)),    # embedding_b tile
            pl.BlockSpec((tile_n, 1), lambda i: (i, 0)),    # labels tile
        ],
        out_specs=pl.BlockSpec((1, 1), lambda i: (i, 0)),   # per-tile partial sum
        compiler_params=pltpu.CompilerParams(
            dimension_semantics=("parallel",),              # independent tiles
            vmem_limit_bytes=int(vmem_limit),
        ),
        cost_estimate=pl.CostEstimate(
            flops=5 * n * d,
            transcendentals=n,
            bytes_accessed=(2 * n * d * itemsize
                            + n * labels.dtype.itemsize
                            + 4 * int(num_tiles)),
        ),
    )(margin_arr, embedding_a, embedding_b, labels_col)

    return jnp.sum(partials) / jnp.float32(n)


def _reference(embedding_a, embedding_b, labels, margin=1.0):
    # Pure-JAX reference mirroring the PyTorch module exactly.
    dist = jnp.sqrt(jnp.sum((embedding_a.astype(jnp.float32)
                             - embedding_b.astype(jnp.float32) + _EPS) ** 2, axis=-1))
    pos = labels * dist ** 2
    neg = (1.0 - labels) * jnp.maximum(margin - dist, 0.0) ** 2
    return jnp.mean(pos + neg)


if __name__ == "__main__":
    # Case 1: small canonical shapes (single tile).
    key = jax.random.PRNGKey(0)
    k_a, k_b, k_l = jax.random.split(key, 3)
    batch, hidden = 8, 32
    a = jax.random.normal(k_a, (batch, hidden), dtype=jnp.float32)
    b = jax.random.normal(k_b, (batch, hidden), dtype=jnp.float32)
    y = jax.random.bernoulli(k_l, 0.5, (batch,)).astype(jnp.float32)

    out = jax.block_until_ready(contrastive_loss(a, b, y, margin=1.0))
    ref = _reference(a, b, y, margin=1.0)
    assert jnp.allclose(out, ref, rtol=1e-5, atol=1e-5), (out, ref)

    # Case 2: ragged multi-tile path (no padding): exercises the masked partial
    # trailing block and the per-tile 'parallel' partial-sum output.
    k_a2, k_b2, k_l2 = jax.random.split(jax.random.PRNGKey(1), 3)
    n2, d2 = 300, 256
    a2 = jax.random.normal(k_a2, (n2, d2), dtype=jnp.float32)
    b2 = jax.random.normal(k_b2, (n2, d2), dtype=jnp.float32)
    y2 = jax.random.bernoulli(k_l2, 0.5, (n2,)).astype(jnp.float32)

    out2 = jax.block_until_ready(
        contrastive_loss(a2, b2, y2, margin=0.75, max_tile_rows=128))
    ref2 = _reference(a2, b2, y2, margin=0.75)
    assert jnp.allclose(out2, ref2, rtol=1e-5, atol=1e-5), (out2, ref2)

    print("KERNEL_OK")
</pallas_src>

<mosaic_0001>
module attributes {stable_mosaic.version = 11 : i64} {
  func.func @_contrastive_loss_kernel(%arg0: i32, %arg1: memref<1x1xf32, #tpu.memory_space<smem>>, %arg2: memref<8x32xf32, #tpu.memory_space<vmem>>, %arg3: memref<8x32xf32, #tpu.memory_space<vmem>>, %arg4: memref<8x1xf32, #tpu.memory_space<vmem>>, %arg5: memref<1x1xf32, #tpu.memory_space<vmem>>) attributes {dimension_semantics = [#tpu.dimension_semantics<parallel>], iteration_bounds = array<i64: 1>, scalar_prefetch = 0 : i64, scratch_operands = 0 : i64, tpu.core_type = #tpu.core_type<tc>, window_params = [{transform_indices = @transform_0, window_bounds = array<i64: 1, 1>}, {transform_indices = @transform_1, window_bounds = array<i64: 8, 32>}, {transform_indices = @transform_2, window_bounds = array<i64: 8, 32>}, {transform_indices = @transform_3, window_bounds = array<i64: 8, 1>}, {transform_indices = @transform_4, window_bounds = array<i64: 1, 1>}]} {
    %c0 = arith.constant 0 : index
    %c0_0 = arith.constant 0 : index
    %0 = vector.load %arg2[%c0, %c0_0] : memref<8x32xf32, #tpu.memory_space<vmem>>, vector<8x32xf32>
    %c0_1 = arith.constant 0 : index
    %c0_2 = arith.constant 0 : index
    %1 = vector.load %arg3[%c0_1, %c0_2] : memref<8x32xf32, #tpu.memory_space<vmem>>, vector<8x32xf32>
    %c0_3 = arith.constant 0 : index
    %c0_4 = arith.constant 0 : index
    %2 = vector.load %arg4[%c0_3, %c0_4] : memref<8x1xf32, #tpu.memory_space<vmem>>, vector<8x1xf32>
    %c0_5 = arith.constant 0 : index
    %c0_6 = arith.constant 0 : index
    %3 = memref.load %arg1[%c0_5, %c0_6] : memref<1x1xf32, #tpu.memory_space<smem>>
    %4 = arith.subf %0, %1 : vector<8x32xf32>
    %cst = arith.constant 9.99999997E-7 : f32
    %5 = vector.broadcast %cst : f32 to vector<8x32xf32>
    %6 = arith.addf %4, %5 : vector<8x32xf32>
    %7 = arith.mulf %6, %6 : vector<8x32xf32>
    %cst_7 = arith.constant dense<0.000000e+00> : vector<8xf32>
    %8 = vector.multi_reduction <add>, %7, %cst_7 [1] : vector<8x32xf32> to vector<8xf32>
    %9 = vector.shape_cast %8 : vector<8xf32> to vector<8x1xf32>
    %10 = math.sqrt %9 : vector<8x1xf32>
    %11 = vector.broadcast %3 : f32 to vector<8x1xf32>
    %12 = arith.subf %11, %10 : vector<8x1xf32>
    %cst_8 = arith.constant 0.000000e+00 : f32
    %13 = vector.broadcast %cst_8 : f32 to vector<8x1xf32>
    %14 = arith.maximumf %12, %13 : vector<8x1xf32>
    %15 = arith.mulf %2, %9 : vector<8x1xf32>
    %cst_9 = arith.constant 1.000000e+00 : f32
    %16 = vector.broadcast %cst_9 : f32 to vector<8x1xf32>
    %17 = arith.subf %16, %2 : vector<8x1xf32>
    %18 = arith.mulf %17, %14 : vector<8x1xf32>
    %19 = arith.mulf %18, %14 : vector<8x1xf32>
    %20 = arith.addf %15, %19 : vector<8x1xf32>
    %21 = vector.shape_cast %20 : vector<8x1xf32> to vector<1x8x1xf32>
    %cst_10 = arith.constant dense<0.000000e+00> : vector<1xf32>
    %22 = vector.multi_reduction <add>, %21, %cst_10 [1, 2] : vector<1x8x1xf32> to vector<1xf32>
    %23 = vector.shape_cast %22 : vector<1xf32> to vector<1x1x1xf32>
    %24 = vector.extract %23[0, 0, 0] : f32 from vector<1x1x1xf32>
    %25 = vector.broadcast %24 : f32 to vector<1x1xf32>
    %c0_11 = arith.constant 0 : index
    %c0_12 = arith.constant 0 : index
    %26 = vector.load %arg5[%c0_11, %c0_12] : memref<1x1xf32, #tpu.memory_space<vmem>>, vector<1x1xf32>
    tpu.vector_store %arg5[%c0_11, %c0_12], %25 {strides = array<i32>} : memref<1x1xf32, #tpu.memory_space<vmem>>, vector<1x1xf32>,
    return
  }
  func.func @transform_0(%arg0: i32) -> (i32, i32) {
    %c0_i32 = arith.constant 0 : i32
    %c0_i32_0 = arith.constant 0 : i32
    %c0_i32_1 = arith.constant 0 : i32
    return %c0_i32, %c0_i32_0 : i32, i32
  }
  func.func @transform_1(%arg0: i32) -> (i32, i32) {
    %c0_i32 = arith.constant 0 : i32
    %c0_i32_0 = arith.constant 0 : i32
    return %arg0, %c0_i32 : i32, i32
  }
  func.func @transform_2(%arg0: i32) -> (i32, i32) {
    %c0_i32 = arith.constant 0 : i32
    %c0_i32_0 = arith.constant 0 : i32
    return %arg0, %c0_i32 : i32, i32
  }
  func.func @transform_3(%arg0: i32) -> (i32, i32) {
    %c0_i32 = arith.constant 0 : i32
    %c0_i32_0 = arith.constant 0 : i32
    return %arg0, %c0_i32 : i32, i32
  }
  func.func @transform_4(%arg0: i32) -> (i32, i32) {
    %c0_i32 = arith.constant 0 : i32
    %c0_i32_0 = arith.constant 0 : i32
    return %arg0, %c0_i32 : i32, i32
  }
}

</mosaic_0001>

<bundles_post_ra>
// kernel: tpu_custom_call.1
= control target key start
LH: loop header
LB: loop body
LE: loop exit
PB: predicated region body
PF: predicated region fallthrough
CT: control target
= control target key end

     0   :  { %s152_s0 = inlined_call_operand.<no memory space> [shape: f32[1,1], index: 0, kind: input, shape index: {}]   ;;  %s153_s1 = inlined_call_operand.vmem [shape: f32[8,32], index: 1, kind: input, shape index: {}]   ;;  %s154_s2 = inlined_call_operand.vmem [shape: f32[8,32], index: 2, kind: input, shape index: {}]   ;;  %s155_s3 = inlined_call_operand.vmem [shape: f32[8,1], index: 3, kind: input, shape index: {}]   ;;  %s156_s4 = inlined_call_operand.hbm [shape: f32[1,1], index: 4, kind: output, shape index: {}]  }
   0x1   :  { %v19_v0 = vld [vmem:[%s153_s1] sm:$0xff] }
   0x2   :  { %v20_v1 = vld [vmem:[%s154_s2] sm:$0xff] }
   0x3   :  { %10 = vsyncpa [#allocation4], 0  ;;  %v23_v2 = vsub.f32 %v19_v0, %v20_v1  ;;  %vm26_vm0 = vcmask 261120   ;;  %v37_v10 = vstv %s152_s0  ;;  %v21_v12 = vld [vmem:[%s155_s3] sm:$0xff]  ;;  %vm45_vm3 = vcmask 7168   ;;  %s102_s0 = smov [#allocation3]  }
   0x4   :  { %v41_v15 = vsub.f32 1.0, %v21_v12  ;;  %s65_s3 = sshll.u32 %s102_s0, 4  ;;  %vm57_vm4 = vcmask 0   ;;  %s66_s3 = int_to_ptr.vmem [resolvable:$true] %s65_s3 }
   0x5   :  { %v24_v3 = vadd.f32 1e-06, %v23_v2  ;;  %s78_s22 = scalar_lea.vmem %s66_s3, 16  ;;  %s82_s23 = scalar_lea.vmem %s66_s3, 32 }
   0x6   :  { %p79_p0 = scmp.ne.s32.totalorder %s66_s3, %s78_s22  ;;  %p83_p1 = scmp.lt.s32.totalorder %s66_s3, %s66_s3 }
   0x7   :  { %v25_v4 = vmul.f32 %v24_v3, %v24_v3  ;;  %p84_p2 = scmp.lt.s32.totalorder %s82_s23, %s78_s22 }
   0x9   :  { %v27_v5 = vsel %vm26_vm0, %v25_v4, 0.0  ;;  %p85_p3 = por %p84_p2, %p83_p1 }
   0xa   :  { %28 = vadd.xlane.f32.xlu0 %v27_v5 }
   0xb   :  { %p86_p4 = pnand %p85_p3, %p79_p0 }
  0x97   :  { %v29_v6 = vpop.xlane.xlu0 %28 }
  0x98   :  { %76 = vrsqrt.f32 %v29_v6  ;;  %vm32_vm1 = vcmp.eq.f32.partialorder %v29_v6, inf  ;;  %v35_v9 = vand.u32 2147483648, %v29_v6  ;;  %vm34_vm2 = vcmp.eq.f32.partialorder %v29_v6, 0.0 }
  0x99   :  { %v40_v18 = vmul.f32 %v29_v6, %v21_v12 }
  0xa2   :  { %v77_v7 = vpop.eup %76 }
  0xa3   :  { %v31_v8 = vmul.f32 %v77_v7, %v29_v6 }
  0xa5   :  { %v33_v11 = vsel %vm32_vm1, %v29_v6, %v31_v8 }
  0xa6   :  { %v36_v13 = vsel %vm34_vm2, %v35_v9, %v33_v11 }
  0xa7   :  { %v38_v14 = vsub.f32 %v37_v10, %v36_v13 }
  0xa9   :  { %v39_v16 = vmax.f32 %v38_v14, 0.0 }
  0xab   :  { %v42_v17 = vmul.f32 %v41_v15, %v39_v16 }
  0xad   :  { %v43_v19 = vmul.f32 %v42_v17, %v39_v16 }
  0xaf   :  { %v44_v20 = vadd.f32 %v43_v19, %v40_v18 }
  0xb1   :  { %v46_v21 = vsel %vm45_vm3, %v44_v20, 0.0 }
  0xb2   :  { %47 = vadd.xlane.f32.xlu0 %v46_v21 }
 0x13f   :  { %v48_v22 = vpop.xlane.xlu0 %47 }
 0x140   :  { %v49_v23 = vrot.slane %v48_v22, 4 }
 0x142   :  { %v50_v24 = vadd.f32 %v49_v23, %v48_v22 }
 0x144   :  { %v51_v25 = vrot.slane %v50_v24, 2 }
 0x146   :  { %v52_v26 = vadd.f32 %v51_v25, %v50_v24 }
 0x148   :  { %v53_v27 = vrot.slane %v52_v26, 1 }
 0x14a   :  { %v54_v28 = vadd.f32 %v53_v27, %v52_v26 }
 0x14c   :  { %73 = vpush %v54_v28 }
 0x17d   :  { %s74_s21 = spop %73 }
 0x17e   :  { %v56_v29 = vstv %s74_s21 }
 0x17f   :  { %58 = vst.msk [vmem:[#allocation3] sm:$0x1] %vm57_vm4, %v56_v29 }
 0x180   :  { %89 = shalt.err (!%p86_p4)
}
 0x181   :  { %s90_s26 = scalar_lea.hbm %s156_s4, 16 }
 0x182   :  { %p91_p5 = scmp.ne.s32.totalorder %s156_s4, %s90_s26  ;;  %p94_p6 = scmp.lt.u32.totalorder %s90_s26, %s156_s4 }
 0x184   :  { %p96_p7 = pnand %p94_p6, %p91_p5 }
 0x186   :  { %99 = shalt.err (!%p96_p7)
}
 0x187   :  { %68 = dma.vmem_to_hbm [thread:$0]  %s66_s3, 16, %s156_s4, [#allocation4]  }
 0x188   :  { %100 = dma.done.wait [#allocation4], 16  }
 0x189   :  { %101 = vsyncadd [#allocation4], 4294967280 }
 0x18a   :  { %72 = vsyncpa [#allocation4], 1 }

</bundles_post_ra>
